<compile_context>
chip_gen: v7x
topology: tpu7x:2x2x1
jax: 0.10.0
libtpu: 0.0.40
codegen_flags: <defaults>
</compile_context>

<pallas_src>
import functools

import jax
import jax.numpy as jnp
from jax import lax
from jax.experimental import pallas as pl
from jax.experimental.pallas import tpu as pltpu


def _round_up(n, m):
    return ((n + m - 1) // m) * m


def _vmem_capacity_bytes():
    """Best-effort per-core VMEM capacity; conservative 64 MiB fallback."""
    try:
        info = pltpu.get_tpu_info()
        for attr in ("vmem_capacity_bytes", "vmem_bytes", "vmem_size_bytes"):
            v = getattr(info, attr, None)
            if v:
                return int(v)
    except Exception:
        pass
    return 64 << 20


def _branch(v, gamma, beta, w1, b1, w2, b2, eps):
    # LayerNorm over last dim (biased variance, like torch.nn.LayerNorm),
    # all elementwise math in f32 (v5e has no bf16 VPU path).
    mu = jnp.mean(v, axis=-1, keepdims=True)
    var = jnp.mean((v - mu) * (v - mu), axis=-1, keepdims=True)
    # Fold the matmul-operand cast into the gamma/beta epilogue so the f32
    # normalized tensor does not stay live across the MXU op.
    vn = (((v - mu) * lax.rsqrt(var + eps)) * gamma + beta).astype(w1.dtype)
    # Linear(half -> d_model) + ReLU; low-precision operands, f32 accumulation.
    h = jnp.dot(vn, w1, preferred_element_type=jnp.float32) + b1
    h = jnp.maximum(h, 0.0).astype(w2.dtype)
    # TODO(synk): Dropout(0.2) / Dropout(dropout) are identity in eval mode.
    # Linear(d_model -> half); f32 accumulation.
    return jnp.dot(h, w2, preferred_element_type=jnp.float32) + b2


def feedforward_kernel(x_ref,
                       gd_ref, bd_ref, wd1_ref, bd1_ref, wd2_ref, bd2_ref,
                       gt_ref, bt_ref, wt1_ref, bt1_ref, wt2_ref, bt2_ref,
                       o_ref, *, half, eps):
    # Process the two halves sequentially, slicing x per half (no full-width
    # f32 copy of x lives across both branches -> smaller VMEM peak).
    drug = x_ref[:, :half].astype(jnp.float32)
    dout = _branch(drug, gd_ref[...], bd_ref[...],
                   wd1_ref[...], bd1_ref[...], wd2_ref[...], bd2_ref[...], eps)
    # Residual add per half, written in place (no lane-axis concatenate; at
    # real scale half == 1024, a multiple of 128 -> unmasked dense stores).
    o_ref[:, :half] = (dout + drug).astype(o_ref.dtype)

    targ = x_ref[:, half:].astype(jnp.float32)
    tout = _branch(targ, gt_ref[...], bt_ref[...],
                   wt1_ref[...], bt1_ref[...], wt2_ref[...], bt2_ref[...], eps)
    o_ref[:, half:] = (tout + targ).astype(o_ref.dtype)


def feedforward(x, params, *, row_block=None, single_buffer_weights=True):
    """x: (..., d_model). params: dict from prepare_params()/init_params()."""
    d_model = x.shape[-1]
    half = d_model // 2
    lead = x.shape[:-1]
    xf = x.reshape(-1, d_model)
    n_rows = xf.shape[0]

    # Generation-aware defaults.
    vmem_cap = _vmem_capacity_bytes()
    small_vmem = vmem_cap <= (64 << 20)                 # v7x-class part
    if small_vmem:
        vmem_ceiling = 56 << 20                         # leave headroom of 64 MiB
        default_rb = 256
    else:                                               # v5e / v6e: 128 MiB VMEM
        vmem_ceiling = min(96 << 20, int(0.75 * vmem_cap))
        default_rb = 512

    # Row tile: multiple of 8 (f32 sublane); no wrapper-side padding needed —
    # the last grid step may cover a partial block.
    rb = default_rb if row_block is None else row_block
    rb = min(rb, _round_up(n_rows, 8))
    rb = max(8, (rb // 8) * 8)
    # Ensure >= 2 grid steps when there is enough work so the "parallel" row
    # axis actually splits across v7x's two TensorCores.
    if pl.cdiv(n_rows, rb) < 2 and n_rows > 8:
        rb = max(8, _round_up(pl.cdiv(n_rows, 2), 8))

    kernel = functools.partial(feedforward_kernel, half=half, eps=1e-6)

    def run(rb_, single_buffer):
        wbuf = 1 if single_buffer else 2
        w_item = jnp.dtype(params["w1_d"].dtype).itemsize
        weight_bytes = 4 * half * d_model * w_item * wbuf       # W1_d,W2_d,W1_t,W2_t
        act_bytes = 2 * 2 * rb_ * d_model * xf.dtype.itemsize   # x & out, 2 buffers each
        scratch_bytes = 8 * rb_ * d_model * 4                   # generous f32 temporaries
        vmem_limit = int(min(max(weight_bytes + act_bytes + scratch_bytes
                                 + (4 << 20), 32 << 20), vmem_ceiling))

        w_kwargs = ({"pipeline_mode": pl.Buffered(1)} if single_buffer else {})
        full_spec = lambda shape: pl.BlockSpec(shape, lambda i: (0, 0), **w_kwargs)
        row_spec = pl.BlockSpec((rb_, d_model), lambda i: (i, 0))

        return pl.pallas_call(
            kernel,
            out_shape=jax.ShapeDtypeStruct((n_rows, d_model), x.dtype),
            grid_spec=pltpu.PrefetchScalarGridSpec(
                num_scalar_prefetch=0,
                grid=(pl.cdiv(n_rows, rb_),),
                in_specs=[
                    row_spec,                       # x (pipelined over rows)
                    full_spec((1, half)),           # gamma_d
                    full_spec((1, half)),           # beta_d
                    full_spec((half, d_model)),     # W1_d (in, out)
                    full_spec((1, d_model)),        # b1_d
                    full_spec((d_model, half)),     # W2_d (in, out)
                    full_spec((1, half)),           # b2_d
                    full_spec((1, half)),           # gamma_t
                    full_spec((1, half)),           # beta_t
                    full_spec((half, d_model)),     # W1_t
                    full_spec((1, d_model)),        # b1_t
                    full_spec((d_model, half)),     # W2_t
                    full_spec((1, half)),           # b2_t
                ],
                out_specs=row_spec,
            ),
            compiler_params=pltpu.CompilerParams(
                dimension_semantics=("parallel",),
                vmem_limit_bytes=vmem_limit),
        )(xf,
          params["gamma_d"], params["beta_d"], params["w1_d"], params["b1_d"],
          params["w2_d"], params["b2_d"],
          params["gamma_t"], params["beta_t"], params["w1_t"], params["b1_t"],
          params["w2_t"], params["b2_t"])

    if single_buffer_weights:
        try:
            out = run(rb, True)
        except Exception:
            # Fallback: default (double-)buffered constant weight blocks; on
            # small-VMEM parts shrink the row tile so the doubled resident
            # weight set still fits (budget is recomputed inside run()).
            out = run(min(rb, 128) if small_vmem else rb, False)
    else:
        out = run(rb, False)

    return out.reshape(*lead, d_model)


def init_params(key, d_model):
    """PyTorch-style f32 parameters (weights already transposed to (in, out))."""
    half = d_model // 2
    ks = jax.random.split(key, 8)
    scale1 = 1.0 / jnp.sqrt(half)
    scale2 = 1.0 / jnp.sqrt(d_model)
    return {
        # LayerNorm params (stored 2D (1, half) for TPU-friendly broadcast)
        "gamma_d": jnp.ones((1, half), jnp.float32),
        "beta_d":  jnp.zeros((1, half), jnp.float32),
        "gamma_t": jnp.ones((1, half), jnp.float32),
        "beta_t":  jnp.zeros((1, half), jnp.float32),
        "w1_d": jax.random.uniform(ks[0], (half, d_model), jnp.float32,
                                   -scale1, scale1),
        "b1_d": jax.random.uniform(ks[1], (1, d_model), jnp.float32,
                                   -scale1, scale1),
        "w2_d": jax.random.uniform(ks[2], (d_model, half), jnp.float32,
                                   -scale2, scale2),
        "b2_d": jax.random.uniform(ks[3], (1, half), jnp.float32,
                                   -scale2, scale2),
        "w1_t": jax.random.uniform(ks[4], (half, d_model), jnp.float32,
                                   -scale1, scale1),
        "b1_t": jax.random.uniform(ks[5], (1, d_model), jnp.float32,
                                   -scale1, scale1),
        "w2_t": jax.random.uniform(ks[6], (d_model, half), jnp.float32,
                                   -scale2, scale2),
        "b2_t": jax.random.uniform(ks[7], (1, half), jnp.float32,
                                   -scale2, scale2),
    }


def prepare_params(params, weight_dtype=jnp.bfloat16):
    """One-time cast of the four matmul weights to the MXU-native dtype.

    Call this ONCE at setup; do NOT cast per forward call (that would add a
    full weight-tensor HBM round-trip in front of every kernel launch).
    """
    return {k: (v.astype(weight_dtype) if k.startswith("w")
                else jnp.asarray(v, jnp.float32))
            for k, v in params.items()}


def feedforward_ref(x, p, eps=1e-6):
    """Pure-JAX f32 reference (same weight values, f32 math)."""
    d_model = x.shape[-1]
    half = d_model // 2
    d, t = x[..., :half], x[..., half:]
    f32 = lambda a: jnp.asarray(a, jnp.float32)

    def ln(v, g, b):
        mu = jnp.mean(v, -1, keepdims=True)
        var = jnp.mean((v - mu) ** 2, -1, keepdims=True)
        return (v - mu) / jnp.sqrt(var + eps) * f32(g)[0] + f32(b)[0]

    def mlp(v, w1, b1, w2, b2):
        h = jnp.maximum(v @ f32(w1) + f32(b1)[0], 0.0)
        return h @ f32(w2) + f32(b2)[0]

    d = mlp(ln(d, p["gamma_d"], p["beta_d"]),
            p["w1_d"], p["b1_d"], p["w2_d"], p["b2_d"])
    t = mlp(ln(t, p["gamma_t"], p["beta_t"]),
            p["w1_t"], p["b1_t"], p["w2_t"], p["b2_t"])
    return jnp.concatenate([d, t], -1) + x


if __name__ == "__main__":
    key = jax.random.PRNGKey(0)
    d_model = 64          # original model uses d_model=2048 (split at 1024)
    batch, seq = 2, 8
    k_x, k_p = jax.random.split(key)
    x = jax.random.normal(k_x, (batch, seq, d_model), jnp.float32)

    params = init_params(k_p, d_model)
    kparams = prepare_params(params)            # one-time bf16 weight cast

    out = jax.block_until_ready(feedforward(x, kparams))
    ref = feedforward_ref(x, kparams)           # same bf16-rounded weights, f32 math

    assert out.shape == x.shape
    # bf16 matmul operands with f32 accumulation -> loosened tolerance.
    err = float(jnp.max(jnp.abs(out - ref)))
    assert jnp.allclose(out, ref, atol=5e-2, rtol=5e-2), err
    print("KERNEL_OK")
</pallas_src>

<mosaic_0001>
module attributes {stable_mosaic.version = 11 : i64} {
  func.func @feedforward_kernel(%arg0: i32, %arg1: memref<8x64xf32, #tpu.memory_space<vmem>>, %arg2: memref<1x32xf32, #tpu.memory_space<vmem>>, %arg3: memref<1x32xf32, #tpu.memory_space<vmem>>, %arg4: memref<32x64xbf16, #tpu.memory_space<vmem>>, %arg5: memref<1x64xf32, #tpu.memory_space<vmem>>, %arg6: memref<64x32xbf16, #tpu.memory_space<vmem>>, %arg7: memref<1x32xf32, #tpu.memory_space<vmem>>, %arg8: memref<1x32xf32, #tpu.memory_space<vmem>>, %arg9: memref<1x32xf32, #tpu.memory_space<vmem>>, %arg10: memref<32x64xbf16, #tpu.memory_space<vmem>>, %arg11: memref<1x64xf32, #tpu.memory_space<vmem>>, %arg12: memref<64x32xbf16, #tpu.memory_space<vmem>>, %arg13: memref<1x32xf32, #tpu.memory_space<vmem>>, %arg14: memref<8x64xf32, #tpu.memory_space<vmem>>) attributes {dimension_semantics = [#tpu.dimension_semantics<parallel>], iteration_bounds = array<i64: 2>, scalar_prefetch = 0 : i64, scratch_operands = 0 : i64, tpu.core_type = #tpu.core_type<tc>, window_params = [{transform_indices = @transform_0, window_bounds = array<i64: 8, 64>}, {pipeline_mode = #tpu.pipeline_mode<synchronous>, transform_indices = @transform_1, window_bounds = array<i64: 1, 32>}, {pipeline_mode = #tpu.pipeline_mode<synchronous>, transform_indices = @transform_2, window_bounds = array<i64: 1, 32>}, {pipeline_mode = #tpu.pipeline_mode<synchronous>, transform_indices = @transform_3, window_bounds = array<i64: 32, 64>}, {pipeline_mode = #tpu.pipeline_mode<synchronous>, transform_indices = @transform_4, window_bounds = array<i64: 1, 64>}, {pipeline_mode = #tpu.pipeline_mode<synchronous>, transform_indices = @transform_5, window_bounds = array<i64: 64, 32>}, {pipeline_mode = #tpu.pipeline_mode<synchronous>, transform_indices = @transform_6, window_bounds = array<i64: 1, 32>}, {pipeline_mode = #tpu.pipeline_mode<synchronous>, transform_indices = @transform_7, window_bounds = array<i64: 1, 32>}, {pipeline_mode = #tpu.pipeline_mode<synchronous>, transform_indices = @transform_8, window_bounds = array<i64: 1, 32>}, {pipeline_mode = #tpu.pipeline_mode<synchronous>, transform_indices = @transform_9, window_bounds = array<i64: 32, 64>}, {pipeline_mode = #tpu.pipeline_mode<synchronous>, transform_indices = @transform_10, window_bounds = array<i64: 1, 64>}, {pipeline_mode = #tpu.pipeline_mode<synchronous>, transform_indices = @transform_11, window_bounds = array<i64: 64, 32>}, {pipeline_mode = #tpu.pipeline_mode<synchronous>, transform_indices = @transform_12, window_bounds = array<i64: 1, 32>}, {transform_indices = @transform_13, window_bounds = array<i64: 8, 64>}]} {
    %c0 = arith.constant 0 : index
    %c0_0 = arith.constant 0 : index
    %0 = vector.load %arg1[%c0, %c0_0] : memref<8x64xf32, #tpu.memory_space<vmem>>, vector<8x32xf32>
    %c0_1 = arith.constant 0 : index
    %c0_2 = arith.constant 0 : index
    %1 = vector.load %arg2[%c0_1, %c0_2] : memref<1x32xf32, #tpu.memory_space<vmem>>, vector<1x32xf32>
    %c0_3 = arith.constant 0 : index
    %c0_4 = arith.constant 0 : index
    %2 = vector.load %arg3[%c0_3, %c0_4] : memref<1x32xf32, #tpu.memory_space<vmem>>, vector<1x32xf32>
    %c0_5 = arith.constant 0 : index
    %c0_6 = arith.constant 0 : index
    %3 = vector.load %arg4[%c0_5, %c0_6] : memref<32x64xbf16, #tpu.memory_space<vmem>>, vector<32x64xbf16>
    %c0_7 = arith.constant 0 : index
    %c0_8 = arith.constant 0 : index
    %4 = vector.load %arg5[%c0_7, %c0_8] : memref<1x64xf32, #tpu.memory_space<vmem>>, vector<1x64xf32>
    %c0_9 = arith.constant 0 : index
    %c0_10 = arith.constant 0 : index
    %5 = vector.load %arg6[%c0_9, %c0_10] : memref<64x32xbf16, #tpu.memory_space<vmem>>, vector<64x32xbf16>
    %c0_11 = arith.constant 0 : index
    %c0_12 = arith.constant 0 : index
    %6 = vector.load %arg7[%c0_11, %c0_12] : memref<1x32xf32, #tpu.memory_space<vmem>>, vector<1x32xf32>
    %cst = arith.constant dense<0.000000e+00> : vector<8xf32>
    %7 = vector.multi_reduction <add>, %0, %cst [1] : vector<8x32xf32> to vector<8xf32>
    %8 = vector.shape_cast %7 : vector<8xf32> to vector<8x1xf32>
    %cst_13 = arith.constant 3.200000e+01 : f32
    %9 = vector.broadcast %cst_13 : f32 to vector<8x1xf32>
    %10 = arith.divf %8, %9 : vector<8x1xf32>
    %11 = vector.broadcast %10 : vector<8x1xf32> to vector<8x32xf32>
    %12 = arith.subf %0, %11 : vector<8x32xf32>
    %13 = vector.broadcast %10 : vector<8x1xf32> to vector<8x32xf32>
    %14 = arith.subf %0, %13 : vector<8x32xf32>
    %15 = arith.mulf %12, %14 : vector<8x32xf32>
    %cst_14 = arith.constant dense<0.000000e+00> : vector<8xf32>
    %16 = vector.multi_reduction <add>, %15, %cst_14 [1] : vector<8x32xf32> to vector<8xf32>
    %17 = vector.shape_cast %16 : vector<8xf32> to vector<8x1xf32>
    %cst_15 = arith.constant 3.200000e+01 : f32
    %18 = vector.broadcast %cst_15 : f32 to vector<8x1xf32>
    %19 = arith.divf %17, %18 : vector<8x1xf32>
    %20 = vector.broadcast %10 : vector<8x1xf32> to vector<8x32xf32>
    %21 = arith.subf %0, %20 : vector<8x32xf32>
    %cst_16 = arith.constant 9.99999997E-7 : f32
    %22 = vector.broadcast %cst_16 : f32 to vector<8x1xf32>
    %23 = arith.addf %19, %22 : vector<8x1xf32>
    %24 = math.rsqrt %23 : vector<8x1xf32>
    %25 = vector.broadcast %24 : vector<8x1xf32> to vector<8x32xf32>
    %26 = arith.mulf %21, %25 : vector<8x32xf32>
    %27 = vector.broadcast %1 : vector<1x32xf32> to vector<8x32xf32>
    %28 = arith.mulf %26, %27 : vector<8x32xf32>
    %29 = vector.broadcast %2 : vector<1x32xf32> to vector<8x32xf32>
    %30 = arith.addf %28, %29 : vector<8x32xf32>
    %31 = arith.truncf %30 : vector<8x32xf32> to vector<8x32xbf16>
    %cst_17 = arith.constant dense<0.000000e+00> : vector<8x64xf32>
    %32 = tpu.matmul %31, %3, %cst_17 {dimension_numbers = #tpu.dot_dimension_numbers<[1], [0], [0], [1], [0, 0, 1, 1], [], []>} : vector<8x32xbf16>, vector<32x64xbf16>, vector<8x64xf32> -> vector<8x64xf32>
    %33 = vector.broadcast %4 : vector<1x64xf32> to vector<8x64xf32>
    %34 = arith.addf %32, %33 : vector<8x64xf32>
    %cst_18 = arith.constant 0.000000e+00 : f32
    %35 = vector.broadcast %cst_18 : f32 to vector<8x64xf32>
    %36 = arith.maximumf %34, %35 : vector<8x64xf32>
    %37 = arith.truncf %36 : vector<8x64xf32> to vector<8x64xbf16>
    %cst_19 = arith.constant dense<0.000000e+00> : vector<8x32xf32>
    %38 = tpu.matmul %37, %5, %cst_19 {dimension_numbers = #tpu.dot_dimension_numbers<[1], [0], [0], [1], [0, 0, 1, 1], [], []>} : vector<8x64xbf16>, vector<64x32xbf16>, vector<8x32xf32> -> vector<8x32xf32>
    %39 = vector.broadcast %6 : vector<1x32xf32> to vector<8x32xf32>
    %40 = arith.addf %38, %39 : vector<8x32xf32>
    %41 = arith.addf %40, %0 : vector<8x32xf32>
    %c0_20 = arith.constant 0 : index
    %c0_21 = arith.constant 0 : index
    %42 = vector.load %arg14[%c0_20, %c0_21] : memref<8x64xf32, #tpu.memory_space<vmem>>, vector<8x32xf32>
    tpu.vector_store %arg14[%c0_20, %c0_21], %41 {strides = array<i32>} : memref<8x64xf32, #tpu.memory_space<vmem>>, vector<8x32xf32>,
    %c0_22 = arith.constant 0 : index
    %c32 = arith.constant 32 : index
    %43 = vector.load %arg1[%c0_22, %c32] : memref<8x64xf32, #tpu.memory_space<vmem>>, vector<8x32xf32>
    %c0_23 = arith.constant 0 : index
    %c0_24 = arith.constant 0 : index
    %44 = vector.load %arg8[%c0_23, %c0_24] : memref<1x32xf32, #tpu.memory_space<vmem>>, vector<1x32xf32>
    %c0_25 = arith.constant 0 : index
    %c0_26 = arith.constant 0 : index
    %45 = vector.load %arg9[%c0_25, %c0_26] : memref<1x32xf32, #tpu.memory_space<vmem>>, vector<1x32xf32>
    %c0_27 = arith.constant 0 : index
    %c0_28 = arith.constant 0 : index
    %46 = vector.load %arg10[%c0_27, %c0_28] : memref<32x64xbf16, #tpu.memory_space<vmem>>, vector<32x64xbf16>
    %c0_29 = arith.constant 0 : index
    %c0_30 = arith.constant 0 : index
    %47 = vector.load %arg11[%c0_29, %c0_30] : memref<1x64xf32, #tpu.memory_space<vmem>>, vector<1x64xf32>
    %c0_31 = arith.constant 0 : index
    %c0_32 = arith.constant 0 : index
    %48 = vector.load %arg12[%c0_31, %c0_32] : memref<64x32xbf16, #tpu.memory_space<vmem>>, vector<64x32xbf16>
    %c0_33 = arith.constant 0 : index
    %c0_34 = arith.constant 0 : index
    %49 = vector.load %arg13[%c0_33, %c0_34] : memref<1x32xf32, #tpu.memory_space<vmem>>, vector<1x32xf32>
    %cst_35 = arith.constant dense<0.000000e+00> : vector<8xf32>
    %50 = vector.multi_reduction <add>, %43, %cst_35 [1] : vector<8x32xf32> to vector<8xf32>
    %51 = vector.shape_cast %50 : vector<8xf32> to vector<8x1xf32>
    %cst_36 = arith.constant 3.200000e+01 : f32
    %52 = vector.broadcast %cst_36 : f32 to vector<8x1xf32>
    %53 = arith.divf %51, %52 : vector<8x1xf32>
    %54 = vector.broadcast %53 : vector<8x1xf32> to vector<8x32xf32>
    %55 = arith.subf %43, %54 : vector<8x32xf32>
    %56 = vector.broadcast %53 : vector<8x1xf32> to vector<8x32xf32>
    %57 = arith.subf %43, %56 : vector<8x32xf32>
    %58 = arith.mulf %55, %57 : vector<8x32xf32>
    %cst_37 = arith.constant dense<0.000000e+00> : vector<8xf32>
    %59 = vector.multi_reduction <add>, %58, %cst_37 [1] : vector<8x32xf32> to vector<8xf32>
    %60 = vector.shape_cast %59 : vector<8xf32> to vector<8x1xf32>
    %cst_38 = arith.constant 3.200000e+01 : f32
    %61 = vector.broadcast %cst_38 : f32 to vector<8x1xf32>
    %62 = arith.divf %60, %61 : vector<8x1xf32>
    %63 = vector.broadcast %53 : vector<8x1xf32> to vector<8x32xf32>
    %64 = arith.subf %43, %63 : vector<8x32xf32>
    %cst_39 = arith.constant 9.99999997E-7 : f32
    %65 = vector.broadcast %cst_39 : f32 to vector<8x1xf32>
    %66 = arith.addf %62, %65 : vector<8x1xf32>
    %67 = math.rsqrt %66 : vector<8x1xf32>
    %68 = vector.broadcast %67 : vector<8x1xf32> to vector<8x32xf32>
    %69 = arith.mulf %64, %68 : vector<8x32xf32>
    %70 = vector.broadcast %44 : vector<1x32xf32> to vector<8x32xf32>
    %71 = arith.mulf %69, %70 : vector<8x32xf32>
    %72 = vector.broadcast %45 : vector<1x32xf32> to vector<8x32xf32>
    %73 = arith.addf %71, %72 : vector<8x32xf32>
    %74 = arith.truncf %73 : vector<8x32xf32> to vector<8x32xbf16>
    %cst_40 = arith.constant dense<0.000000e+00> : vector<8x64xf32>
    %75 = tpu.matmul %74, %46, %cst_40 {dimension_numbers = #tpu.dot_dimension_numbers<[1], [0], [0], [1], [0, 0, 1, 1], [], []>} : vector<8x32xbf16>, vector<32x64xbf16>, vector<8x64xf32> -> vector<8x64xf32>
    %76 = vector.broadcast %47 : vector<1x64xf32> to vector<8x64xf32>
    %77 = arith.addf %75, %76 : vector<8x64xf32>
    %cst_41 = arith.constant 0.000000e+00 : f32
    %78 = vector.broadcast %cst_41 : f32 to vector<8x64xf32>
    %79 = arith.maximumf %77, %78 : vector<8x64xf32>
    %80 = arith.truncf %79 : vector<8x64xf32> to vector<8x64xbf16>
    %cst_42 = arith.constant dense<0.000000e+00> : vector<8x32xf32>
    %81 = tpu.matmul %80, %48, %cst_42 {dimension_numbers = #tpu.dot_dimension_numbers<[1], [0], [0], [1], [0, 0, 1, 1], [], []>} : vector<8x64xbf16>, vector<64x32xbf16>, vector<8x32xf32> -> vector<8x32xf32>
    %82 = vector.broadcast %49 : vector<1x32xf32> to vector<8x32xf32>
    %83 = arith.addf %81, %82 : vector<8x32xf32>
    %84 = arith.addf %83, %43 : vector<8x32xf32>
    %c0_43 = arith.constant 0 : index
    %c32_44 = arith.constant 32 : index
    %85 = vector.load %arg14[%c0_43, %c32_44] : memref<8x64xf32, #tpu.memory_space<vmem>>, vector<8x32xf32>
    tpu.vector_store %arg14[%c0_43, %c32_44], %84 {strides = array<i32>} : memref<8x64xf32, #tpu.memory_space<vmem>>, vector<8x32xf32>,
    return
  }
  func.func @transform_0(%arg0: i32) -> (i32, i32) {
    %c0_i32 = arith.constant 0 : i32
    %c0_i32_0 = arith.constant 0 : i32
    return %arg0, %c0_i32 : i32, i32
  }
  func.func @transform_1(%arg0: i32) -> (i32, i32) {
    %c0_i32 = arith.constant 0 : i32
    %c0_i32_0 = arith.constant 0 : i32
    %c0_i32_1 = arith.constant 0 : i32
    return %c0_i32, %c0_i32_0 : i32, i32
  }
  func.func @transform_2(%arg0: i32) -> (i32, i32) {
    %c0_i32 = arith.constant 0 : i32
    %c0_i32_0 = arith.constant 0 : i32
    %c0_i32_1 = arith.constant 0 : i32
    return %c0_i32, %c0_i32_0 : i32, i32
  }
  func.func @transform_3(%arg0: i32) -> (i32, i32) {
    %c0_i32 = arith.constant 0 : i32
    %c0_i32_0 = arith.constant 0 : i32
    %c0_i32_1 = arith.constant 0 : i32
    return %c0_i32, %c0_i32_0 : i32, i32
  }
  func.func @transform_4(%arg0: i32) -> (i32, i32) {
    %c0_i32 = arith.constant 0 : i32
    %c0_i32_0 = arith.constant 0 : i32
    %c0_i32_1 = arith.constant 0 : i32
    return %c0_i32, %c0_i32_0 : i32, i32
  }
  func.func @transform_5(%arg0: i32) -> (i32, i32) {
    %c0_i32 = arith.constant 0 : i32
    %c0_i32_0 = arith.constant 0 : i32
    %c0_i32_1 = arith.constant 0 : i32
    return %c0_i32, %c0_i32_0 : i32, i32
  }
  func.func @transform_6(%arg0: i32) -> (i32, i32) {
    %c0_i32 = arith.constant 0 : i32
    %c0_i32_0 = arith.constant 0 : i32
    %c0_i32_1 = arith.constant 0 : i32
    return %c0_i32, %c0_i32_0 : i32, i32
  }
  func.func @transform_7(%arg0: i32) -> (i32, i32) {
    %c0_i32 = arith.constant 0 : i32
    %c0_i32_0 = arith.constant 0 : i32
    %c0_i32_1 = arith.constant 0 : i32
    return %c0_i32, %c0_i32_0 : i32, i32
  }
  func.func @transform_8(%arg0: i32) -> (i32, i32) {
    %c0_i32 = arith.constant 0 : i32
    %c0_i32_0 = arith.constant 0 : i32
    %c0_i32_1 = arith.constant 0 : i32
    return %c0_i32, %c0_i32_0 : i32, i32
  }
  func.func @transform_9(%arg0: i32) -> (i32, i32) {
    %c0_i32 = arith.constant 0 : i32
    %c0_i32_0 = arith.constant 0 : i32
    %c0_i32_1 = arith.constant 0 : i32
    return %c0_i32, %c0_i32_0 : i32, i32
  }
  func.func @transform_10(%arg0: i32) -> (i32, i32) {
    %c0_i32 = arith.constant 0 : i32
    %c0_i32_0 = arith.constant 0 : i32
    %c0_i32_1 = arith.constant 0 : i32
    return %c0_i32, %c0_i32_0 : i32, i32
  }
  func.func @transform_11(%arg0: i32) -> (i32, i32) {
    %c0_i32 = arith.constant 0 : i32
    %c0_i32_0 = arith.constant 0 : i32
    %c0_i32_1 = arith.constant 0 : i32
    return %c0_i32, %c0_i32_0 : i32, i32
  }
  func.func @transform_12(%arg0: i32) -> (i32, i32) {
    %c0_i32 = arith.constant 0 : i32
    %c0_i32_0 = arith.constant 0 : i32
    %c0_i32_1 = arith.constant 0 : i32
    return %c0_i32, %c0_i32_0 : i32, i32
  }
  func.func @transform_13(%arg0: i32) -> (i32, i32) {
    %c0_i32 = arith.constant 0 : i32
    %c0_i32_0 = arith.constant 0 : i32
    return %arg0, %c0_i32 : i32, i32
  }
}

module attributes {stable_mosaic.version = 11 : i64} {
  func.func @feedforward_kernel(%arg0: i32, %arg1: memref<8x64xf32, #tpu.memory_space<vmem>>, %arg2: memref<1x32xf32, #tpu.memory_space<vmem>>, %arg3: memref<1x32xf32, #tpu.memory_space<vmem>>, %arg4: memref<32x64xbf16, #tpu.memory_space<vmem>>, %arg5: memref<1x64xf32, #tpu.memory_space<vmem>>, %arg6: memref<64x32xbf16, #tpu.memory_space<vmem>>, %arg7: memref<1x32xf32, #tpu.memory_space<vmem>>, %arg8: memref<1x32xf32, #tpu.memory_space<vmem>>, %arg9: memref<1x32xf32, #tpu.memory_space<vmem>>, %arg10: memref<32x64xbf16, #tpu.memory_space<vmem>>, %arg11: memref<1x64xf32, #tpu.memory_space<vmem>>, %arg12: memref<64x32xbf16, #tpu.memory_space<vmem>>, %arg13: memref<1x32xf32, #tpu.memory_space<vmem>>, %arg14: memref<8x64xf32, #tpu.memory_space<vmem>>) attributes {dimension_semantics = [#tpu.dimension_semantics<parallel>], iteration_bounds = array<i64: 2>, scalar_prefetch = 0 : i64, scratch_operands = 0 : i64, tpu.core_type = #tpu.core_type<tc>, window_params = [{transform_indices = @transform_0, window_bounds = array<i64: 8, 64>}, {pipeline_mode = #tpu.pipeline_mode<synchronous>, transform_indices = @transform_1, window_bounds = array<i64: 1, 32>}, {pipeline_mode = #tpu.pipeline_mode<synchronous>, transform_indices = @transform_2, window_bounds = array<i64: 1, 32>}, {pipeline_mode = #tpu.pipeline_mode<synchronous>, transform_indices = @transform_3, window_bounds = array<i64: 32, 64>}, {pipeline_mode = #tpu.pipeline_mode<synchronous>, transform_indices = @transform_4, window_bounds = array<i64: 1, 64>}, {pipeline_mode = #tpu.pipeline_mode<synchronous>, transform_indices = @transform_5, window_bounds = array<i64: 64, 32>}, {pipeline_mode = #tpu.pipeline_mode<synchronous>, transform_indices = @transform_6, window_bounds = array<i64: 1, 32>}, {pipeline_mode = #tpu.pipeline_mode<synchronous>, transform_indices = @transform_7, window_bounds = array<i64: 1, 32>}, {pipeline_mode = #tpu.pipeline_mode<synchronous>, transform_indices = @transform_8, window_bounds = array<i64: 1, 32>}, {pipeline_mode = #tpu.pipeline_mode<synchronous>, transform_indices = @transform_9, window_bounds = array<i64: 32, 64>}, {pipeline_mode = #tpu.pipeline_mode<synchronous>, transform_indices = @transform_10, window_bounds = array<i64: 1, 64>}, {pipeline_mode = #tpu.pipeline_mode<synchronous>, transform_indices = @transform_11, window_bounds = array<i64: 64, 32>}, {pipeline_mode = #tpu.pipeline_mode<synchronous>, transform_indices = @transform_12, window_bounds = array<i64: 1, 32>}, {transform_indices = @transform_13, window_bounds = array<i64: 8, 64>}]} {
    %c0 = arith.constant 0 : index
    %c0_0 = arith.constant 0 : index
    %0 = vector.load %arg1[%c0, %c0_0] : memref<8x64xf32, #tpu.memory_space<vmem>>, vector<8x32xf32>
    %c0_1 = arith.constant 0 : index
    %c0_2 = arith.constant 0 : index
    %1 = vector.load %arg2[%c0_1, %c0_2] : memref<1x32xf32, #tpu.memory_space<vmem>>, vector<1x32xf32>
    %c0_3 = arith.constant 0 : index
    %c0_4 = arith.constant 0 : index
    %2 = vector.load %arg3[%c0_3, %c0_4] : memref<1x32xf32, #tpu.memory_space<vmem>>, vector<1x32xf32>
    %c0_5 = arith.constant 0 : index
    %c0_6 = arith.constant 0 : index
    %3 = vector.load %arg4[%c0_5, %c0_6] : memref<32x64xbf16, #tpu.memory_space<vmem>>, vector<32x64xbf16>
    %c0_7 = arith.constant 0 : index
    %c0_8 = arith.constant 0 : index
    %4 = vector.load %arg5[%c0_7, %c0_8] : memref<1x64xf32, #tpu.memory_space<vmem>>, vector<1x64xf32>
    %c0_9 = arith.constant 0 : index
    %c0_10 = arith.constant 0 : index
    %5 = vector.load %arg6[%c0_9, %c0_10] : memref<64x32xbf16, #tpu.memory_space<vmem>>, vector<64x32xbf16>
    %c0_11 = arith.constant 0 : index
    %c0_12 = arith.constant 0 : index
    %6 = vector.load %arg7[%c0_11, %c0_12] : memref<1x32xf32, #tpu.memory_space<vmem>>, vector<1x32xf32>
    %cst = arith.constant dense<0.000000e+00> : vector<8xf32>
    %7 = vector.multi_reduction <add>, %0, %cst [1] : vector<8x32xf32> to vector<8xf32>
    %8 = vector.shape_cast %7 : vector<8xf32> to vector<8x1xf32>
    %cst_13 = arith.constant 3.200000e+01 : f32
    %9 = vector.broadcast %cst_13 : f32 to vector<8x1xf32>
    %10 = arith.divf %8, %9 : vector<8x1xf32>
    %11 = vector.broadcast %10 : vector<8x1xf32> to vector<8x32xf32>
    %12 = arith.subf %0, %11 : vector<8x32xf32>
    %13 = vector.broadcast %10 : vector<8x1xf32> to vector<8x32xf32>
    %14 = arith.subf %0, %13 : vector<8x32xf32>
    %15 = arith.mulf %12, %14 : vector<8x32xf32>
    %cst_14 = arith.constant dense<0.000000e+00> : vector<8xf32>
    %16 = vector.multi_reduction <add>, %15, %cst_14 [1] : vector<8x32xf32> to vector<8xf32>
    %17 = vector.shape_cast %16 : vector<8xf32> to vector<8x1xf32>
    %cst_15 = arith.constant 3.200000e+01 : f32
    %18 = vector.broadcast %cst_15 : f32 to vector<8x1xf32>
    %19 = arith.divf %17, %18 : vector<8x1xf32>
    %20 = vector.broadcast %10 : vector<8x1xf32> to vector<8x32xf32>
    %21 = arith.subf %0, %20 : vector<8x32xf32>
    %cst_16 = arith.constant 9.99999997E-7 : f32
    %22 = vector.broadcast %cst_16 : f32 to vector<8x1xf32>
    %23 = arith.addf %19, %22 : vector<8x1xf32>
    %24 = math.rsqrt %23 : vector<8x1xf32>
    %25 = vector.broadcast %24 : vector<8x1xf32> to vector<8x32xf32>
    %26 = arith.mulf %21, %25 : vector<8x32xf32>
    %27 = vector.broadcast %1 : vector<1x32xf32> to vector<8x32xf32>
    %28 = arith.mulf %26, %27 : vector<8x32xf32>
    %29 = vector.broadcast %2 : vector<1x32xf32> to vector<8x32xf32>
    %30 = arith.addf %28, %29 : vector<8x32xf32>
    %31 = arith.truncf %30 : vector<8x32xf32> to vector<8x32xbf16>
    %cst_17 = arith.constant dense<0.000000e+00> : vector<8x64xf32>
    %32 = tpu.matmul %31, %3, %cst_17 {dimension_numbers = #tpu.dot_dimension_numbers<[1], [0], [0], [1], [0, 0, 1, 1], [], []>} : vector<8x32xbf16>, vector<32x64xbf16>, vector<8x64xf32> -> vector<8x64xf32>
    %33 = vector.broadcast %4 : vector<1x64xf32> to vector<8x64xf32>
    %34 = arith.addf %32, %33 : vector<8x64xf32>
    %cst_18 = arith.constant 0.000000e+00 : f32
    %35 = vector.broadcast %cst_18 : f32 to vector<8x64xf32>
    %36 = arith.maximumf %34, %35 : vector<8x64xf32>
    %37 = arith.truncf %36 : vector<8x64xf32> to vector<8x64xbf16>
    %cst_19 = arith.constant dense<0.000000e+00> : vector<8x32xf32>
    %38 = tpu.matmul %37, %5, %cst_19 {dimension_numbers = #tpu.dot_dimension_numbers<[1], [0], [0], [1], [0, 0, 1, 1], [], []>} : vector<8x64xbf16>, vector<64x32xbf16>, vector<8x32xf32> -> vector<8x32xf32>
    %39 = vector.broadcast %6 : vector<1x32xf32> to vector<8x32xf32>
    %40 = arith.addf %38, %39 : vector<8x32xf32>
    %41 = arith.addf %40, %0 : vector<8x32xf32>
    %c0_20 = arith.constant 0 : index
    %c0_21 = arith.constant 0 : index
    %42 = vector.load %arg14[%c0_20, %c0_21] : memref<8x64xf32, #tpu.memory_space<vmem>>, vector<8x32xf32>
    tpu.vector_store %arg14[%c0_20, %c0_21], %41 {strides = array<i32>} : memref<8x64xf32, #tpu.memory_space<vmem>>, vector<8x32xf32>,
    %c0_22 = arith.constant 0 : index
    %c32 = arith.constant 32 : index
    %43 = vector.load %arg1[%c0_22, %c32] : memref<8x64xf32, #tpu.memory_space<vmem>>, vector<8x32xf32>
    %c0_23 = arith.constant 0 : index
    %c0_24 = arith.constant 0 : index
    %44 = vector.load %arg8[%c0_23, %c0_24] : memref<1x32xf32, #tpu.memory_space<vmem>>, vector<1x32xf32>
    %c0_25 = arith.constant 0 : index
    %c0_26 = arith.constant 0 : index
    %45 = vector.load %arg9[%c0_25, %c0_26] : memref<1x32xf32, #tpu.memory_space<vmem>>, vector<1x32xf32>
    %c0_27 = arith.constant 0 : index
    %c0_28 = arith.constant 0 : index
    %46 = vector.load %arg10[%c0_27, %c0_28] : memref<32x64xbf16, #tpu.memory_space<vmem>>, vector<32x64xbf16>
    %c0_29 = arith.constant 0 : index
    %c0_30 = arith.constant 0 : index
    %47 = vector.load %arg11[%c0_29, %c0_30] : memref<1x64xf32, #tpu.memory_space<vmem>>, vector<1x64xf32>
    %c0_31 = arith.constant 0 : index
    %c0_32 = arith.constant 0 : index
    %48 = vector.load %arg12[%c0_31, %c0_32] : memref<64x32xbf16, #tpu.memory_space<vmem>>, vector<64x32xbf16>
    %c0_33 = arith.constant 0 : index
    %c0_34 = arith.constant 0 : index
    %49 = vector.load %arg13[%c0_33, %c0_34] : memref<1x32xf32, #tpu.memory_space<vmem>>, vector<1x32xf32>
    %cst_35 = arith.constant dense<0.000000e+00> : vector<8xf32>
    %50 = vector.multi_reduction <add>, %43, %cst_35 [1] : vector<8x32xf32> to vector<8xf32>
    %51 = vector.shape_cast %50 : vector<8xf32> to vector<8x1xf32>
    %cst_36 = arith.constant 3.200000e+01 : f32
    %52 = vector.broadcast %cst_36 : f32 to vector<8x1xf32>
    %53 = arith.divf %51, %52 : vector<8x1xf32>
    %54 = vector.broadcast %53 : vector<8x1xf32> to vector<8x32xf32>
    %55 = arith.subf %43, %54 : vector<8x32xf32>
    %56 = vector.broadcast %53 : vector<8x1xf32> to vector<8x32xf32>
    %57 = arith.subf %43, %56 : vector<8x32xf32>
    %58 = arith.mulf %55, %57 : vector<8x32xf32>
    %cst_37 = arith.constant dense<0.000000e+00> : vector<8xf32>
    %59 = vector.multi_reduction <add>, %58, %cst_37 [1] : vector<8x32xf32> to vector<8xf32>
    %60 = vector.shape_cast %59 : vector<8xf32> to vector<8x1xf32>
    %cst_38 = arith.constant 3.200000e+01 : f32
    %61 = vector.broadcast %cst_38 : f32 to vector<8x1xf32>
    %62 = arith.divf %60, %61 : vector<8x1xf32>
    %63 = vector.broadcast %53 : vector<8x1xf32> to vector<8x32xf32>
    %64 = arith.subf %43, %63 : vector<8x32xf32>
    %cst_39 = arith.constant 9.99999997E-7 : f32
    %65 = vector.broadcast %cst_39 : f32 to vector<8x1xf32>
    %66 = arith.addf %62, %65 : vector<8x1xf32>
    %67 = math.rsqrt %66 : vector<8x1xf32>
    %68 = vector.broadcast %67 : vector<8x1xf32> to vector<8x32xf32>
    %69 = arith.mulf %64, %68 : vector<8x32xf32>
    %70 = vector.broadcast %44 : vector<1x32xf32> to vector<8x32xf32>
    %71 = arith.mulf %69, %70 : vector<8x32xf32>
    %72 = vector.broadcast %45 : vector<1x32xf32> to vector<8x32xf32>
    %73 = arith.addf %71, %72 : vector<8x32xf32>
    %74 = arith.truncf %73 : vector<8x32xf32> to vector<8x32xbf16>
    %cst_40 = arith.constant dense<0.000000e+00> : vector<8x64xf32>
    %75 = tpu.matmul %74, %46, %cst_40 {dimension_numbers = #tpu.dot_dimension_numbers<[1], [0], [0], [1], [0, 0, 1, 1], [], []>} : vector<8x32xbf16>, vector<32x64xbf16>, vector<8x64xf32> -> vector<8x64xf32>
    %76 = vector.broadcast %47 : vector<1x64xf32> to vector<8x64xf32>
    %77 = arith.addf %75, %76 : vector<8x64xf32>
    %cst_41 = arith.constant 0.000000e+00 : f32
    %78 = vector.broadcast %cst_41 : f32 to vector<8x64xf32>
    %79 = arith.maximumf %77, %78 : vector<8x64xf32>
    %80 = arith.truncf %79 : vector<8x64xf32> to vector<8x64xbf16>
    %cst_42 = arith.constant dense<0.000000e+00> : vector<8x32xf32>
    %81 = tpu.matmul %80, %48, %cst_42 {dimension_numbers = #tpu.dot_dimension_numbers<[1], [0], [0], [1], [0, 0, 1, 1], [], []>} : vector<8x64xbf16>, vector<64x32xbf16>, vector<8x32xf32> -> vector<8x32xf32>
    %82 = vector.broadcast %49 : vector<1x32xf32> to vector<8x32xf32>
    %83 = arith.addf %81, %82 : vector<8x32xf32>
    %84 = arith.addf %83, %43 : vector<8x32xf32>
    %c0_43 = arith.constant 0 : index
    %c32_44 = arith.constant 32 : index
    %85 = vector.load %arg14[%c0_43, %c32_44] : memref<8x64xf32, #tpu.memory_space<vmem>>, vector<8x32xf32>
    tpu.vector_store %arg14[%c0_43, %c32_44], %84 {strides = array<i32>} : memref<8x64xf32, #tpu.memory_space<vmem>>, vector<8x32xf32>,
    return
  }
  func.func @transform_0(%arg0: i32) -> (i32, i32) {
    %c0_i32 = arith.constant 0 : i32
    %c0_i32_0 = arith.constant 0 : i32
    return %arg0, %c0_i32 : i32, i32
  }
  func.func @transform_1(%arg0: i32) -> (i32, i32) {
    %c0_i32 = arith.constant 0 : i32
    %c0_i32_0 = arith.constant 0 : i32
    %c0_i32_1 = arith.constant 0 : i32
    return %c0_i32, %c0_i32_0 : i32, i32
  }
  func.func @transform_2(%arg0: i32) -> (i32, i32) {
    %c0_i32 = arith.constant 0 : i32
    %c0_i32_0 = arith.constant 0 : i32
    %c0_i32_1 = arith.constant 0 : i32
    return %c0_i32, %c0_i32_0 : i32, i32
  }
  func.func @transform_3(%arg0: i32) -> (i32, i32) {
    %c0_i32 = arith.constant 0 : i32
    %c0_i32_0 = arith.constant 0 : i32
    %c0_i32_1 = arith.constant 0 : i32
    return %c0_i32, %c0_i32_0 : i32, i32
  }
  func.func @transform_4(%arg0: i32) -> (i32, i32) {
    %c0_i32 = arith.constant 0 : i32
    %c0_i32_0 = arith.constant 0 : i32
    %c0_i32_1 = arith.constant 0 : i32
    return %c0_i32, %c0_i32_0 : i32, i32
  }
  func.func @transform_5(%arg0: i32) -> (i32, i32) {
    %c0_i32 = arith.constant 0 : i32
    %c0_i32_0 = arith.constant 0 : i32
    %c0_i32_1 = arith.constant 0 : i32
    return %c0_i32, %c0_i32_0 : i32, i32
  }
  func.func @transform_6(%arg0: i32) -> (i32, i32) {
    %c0_i32 = arith.constant 0 : i32
    %c0_i32_0 = arith.constant 0 : i32
    %c0_i32_1 = arith.constant 0 : i32
    return %c0_i32, %c0_i32_0 : i32, i32
  }
  func.func @transform_7(%arg0: i32) -> (i32, i32) {
    %c0_i32 = arith.constant 0 : i32
    %c0_i32_0 = arith.constant 0 : i32
    %c0_i32_1 = arith.constant 0 : i32
    return %c0_i32, %c0_i32_0 : i32, i32
  }
  func.func @transform_8(%arg0: i32) -> (i32, i32) {
    %c0_i32 = arith.constant 0 : i32
    %c0_i32_0 = arith.constant 0 : i32
    %c0_i32_1 = arith.constant 0 : i32
    return %c0_i32, %c0_i32_0 : i32, i32
  }
  func.func @transform_9(%arg0: i32) -> (i32, i32) {
    %c0_i32 = arith.constant 0 : i32
    %c0_i32_0 = arith.constant 0 : i32
    %c0_i32_1 = arith.constant 0 : i32
    return %c0_i32, %c0_i32_0 : i32, i32
  }
  func.func @transform_10(%arg0: i32) -> (i32, i32) {
    %c0_i32 = arith.constant 0 : i32
    %c0_i32_0 = arith.constant 0 : i32
    %c0_i32_1 = arith.constant 0 : i32
    return %c0_i32, %c0_i32_0 : i32, i32
  }
  func.func @transform_11(%arg0: i32) -> (i32, i32) {
    %c0_i32 = arith.constant 0 : i32
    %c0_i32_0 = arith.constant 0 : i32
    %c0_i32_1 = arith.constant 0 : i32
    return %c0_i32, %c0_i32_0 : i32, i32
  }
  func.func @transform_12(%arg0: i32) -> (i32, i32) {
    %c0_i32 = arith.constant 0 : i32
    %c0_i32_0 = arith.constant 0 : i32
    %c0_i32_1 = arith.constant 0 : i32
    return %c0_i32, %c0_i32_0 : i32, i32
  }
  func.func @transform_13(%arg0: i32) -> (i32, i32) {
    %c0_i32 = arith.constant 0 : i32
    %c0_i32_0 = arith.constant 0 : i32
    return %arg0, %c0_i32 : i32, i32
  }
}

</mosaic_0001>

<bundles_post_ra>
// kernel: tpu_custom_call.1
= control target key start
LH: loop header
LB: loop body
LE: loop exit
PB: predicated region body
PF: predicated region fallthrough
CT: control target
= control target key end

     0   :  { %s1391_s0 = inlined_call_operand.vmem [shape: f32[16,64], index: 0, kind: input, shape index: {}]   ;;  %s1392_s1 = inlined_call_operand.vmem [shape: f32[1,32], index: 1, kind: input, shape index: {}]   ;;  %s1393_s2 = inlined_call_operand.vmem [shape: f32[1,32], index: 2, kind: input, shape index: {}]   ;;  %s1394_s3 = inlined_call_operand.vmem [shape: bf16[32,64], index: 3, kind: input, shape index: {}]   ;;  %s1395_s4 = inlined_call_operand.vmem [shape: f32[1,64], index: 4, kind: input, shape index: {}]   ;;  %s1396_s5 = inlined_call_operand.vmem [shape: bf16[64,32], index: 5, kind: input, shape index: {}]   ;;  %s1397_s6 = inlined_call_operand.vmem [shape: f32[1,32], index: 6, kind: input, shape index: {}]   ;;  %s1398_s7 = inlined_call_operand.vmem [shape: f32[1,32], index: 7, kind: input, shape index: {}]   ;;  %s1399_s8 = inlined_call_operand.vmem [shape: f32[1,32], index: 8, kind: input, shape index: {}]   ;;  %s1400_s9 = inlined_call_operand.vmem [shape: bf16[32,64], index: 9, kind: input, shape index: {}]   ;;  %s1401_s10 = inlined_call_operand.vmem [shape: f32[1,64], index: 10, kind: input, shape index: {}]   ;;  %s1402_s11 = inlined_call_operand.vmem [shape: bf16[64,32], index: 11, kind: input, shape index: {}]   ;;  %s1403_s12 = inlined_call_operand.vmem [shape: f32[1,32], index: 12, kind: input, shape index: {}]   ;;  %s1404_s13 = inlined_call_operand.hbm [shape: f32[16,64], index: 13, kind: output, shape index: {}]  }
   0x1   :  { %1406 = sst [smem:[#allocation5_spill]] %s1391_s0 }
   0x2   :  { %1407 = sst [smem:[#allocation6_spill]] %s1392_s1 }
   0x3   :  { %1408 = sst [smem:[#allocation7_spill]] %s1393_s2 }
   0x4   :  { %18 = vsyncpa [#allocation3], 0 }
   0x5   :  { %20 = vsyncpa [#allocation3 + $0x1], 0  ;;  %s1187_s25 = smov 0   ;;  %s1189_s26 = smov 0  }
   0x6   :  { %s1191_s27 = smov 0   ;;  %s1193_s28 = smov 0  }
   0x7 LB: > { %s1208_s29 = sadd.s32 4294967295, %s1110_s28   ;;  %s899_s30 = sadd.s32 4294967294, %s1110_s28   ;;  %s1110_s28 = sphi %s1193_s28, %s1418_s28   ;;  %s1106_s27 = sphi %s1191_s27, %s1417_s27   ;;  %s1102_s26 = sphi %s1189_s26, %s1416_s26   ;;  %s1098_s25 = sphi %s1187_s25, %s1415_s25  }
   0x8   : > { %s1212_s14 = sadd.s32 1, %s1110_s28   ;;  %s311_s15 = sadd.s32 1, %s1106_s27 }
   0x9   : > { %s308_s16 = ssub.s32 %s1110_s28, %s1212_s14  ;;  %p321_p0 = scmp.ne.s32.totalorder %s1106_s27, %s1102_s26 }
   0xa   : > { %p309_p1 = scmp.eq.s32.totalorder %s308_s16, 0  ;;  %p322_p2 = scmp.eq.s32.totalorder %s1208_s29, 1 }
   0xb   : > { %p327_p3 = scmp.ne.s32.totalorder %s1102_s26, %s1098_s25  ;;  %p328_p4 = scmp.eq.s32.totalorder %s899_s30, 1 }
   0xc   : > { %s1223_s17 = scalar_select %p309_p1, %s1106_s27, %s311_s15  }
   0xd   : > { %p1225_p5 = por %p322_p2, %p321_p0  ;;  %p1229_p6 = por %p328_p4, %p327_p3 }
   0xe   : > { %p902_p7 = scmp.ge.s32.totalorder %s1110_s28, 1  ;;  %p389_p8 = scmp.lt.s32.totalorder %s1110_s28, 3 }
  0x10   : > { %p390_p9 = pnand %p902_p7, %p389_p8 }
  0x11   : > { %p432_p10 = scmp.lt.s32.totalorder (!%p390_p9), %s1208_s29, 1  ;;  %s1411_s0 = sld [smem:[#allocation5_spill]] (!%p390_p9)  ;;  %vm454_vm0 = vcmask (!%p390_p9), 261120   ;;  %v917_v3 = vld [vmem:[%s1398_s7] ss:$0 sm:$0xff] (!%p390_p9)  ;;  %v1114_v13 = vmov (!%p390_p9), 0.0  }
  0x12   : > { %393 = sbr.rel (%p390_p9) target bundleno = 1253 (0x4e5), region = 72  ;;  %s1112_s30 = smov (!%p390_p9), 96   ;;  %v918_v11 = vld [vmem:[%s1399_s8] ss:$0 sm:$0xff] (!%p390_p9)  ;;  %969 = vmatprep.subr.bf16.mxu0 (!%p390_p9), %v1114_v13  ;;  %vm1115_vm1 = vmmov (!%p390_p9), 0   ;;  %v1033_v14 = vld [vmem:[%s1400_s9 + $0x8] sm:$0xff] (!%p390_p9)   ;;  %949 = vmatprep.subr.bf16.mxu1 (!%p390_p9), %v1114_v13 }
  0x13   : > { %v1032_v12 = vld [vmem:[%s1400_s9] sm:$0xff] (!%p390_p9)   ;;  %973 = vmatprep.mubr.msk.bf16.mxu0 (!%p390_p9), %vm1115_vm1, %v1114_v13  ;;  %953 = vmatprep.mubr.msk.bf16.mxu1 (!%p390_p9), %vm1115_vm1, %v1114_v13  ;;  %v1035_v31 = vld [vmem:[%s1394_s3 + $0x8] sm:$0xff] (!%p390_p9)   ;;  %s1412_s1 = sld [smem:[#allocation6_spill]] (!%p390_p9)  ;;  %s1413_s2 = sld [smem:[#allocation7_spill]] (!%p390_p9)  ;;  %v1038_v43 = vld [vmem:[%s1402_s11 + $0x10] sm:$0xff] (!%p390_p9)   ;;  %vm577_vm2 = vcmask (!%p390_p9), 523264  }
  0x14   : > { %970 = vmatpush3.bf16.msra.mxu0 (!%p390_p9), %v1032_v12  ;;  %v1034_v30 = vld [vmem:[%s1394_s3] sm:$0xff] (!%p390_p9)   ;;  %v1037_v34 = vld [vmem:[%s1402_s11 + $0x8] sm:$0xff] (!%p390_p9)   ;;  %v1039_v46 = vld [vmem:[%s1402_s11 + $0x18] sm:$0xff] (!%p390_p9)   ;;  %s1414_s16 = smov (!%p390_p9), 32   ;;  %vm824_vm3 = vcmask (!%p390_p9), 523520  }
  0x15   : > { %971 = vmatprep.subr.bf16.mxu0 (!%p390_p9), %v1114_v13  ;;  %950 = vmatpush3.bf16.msra.mxu1 (!%p390_p9), %v1034_v30  ;;  %v1036_v32 = vld [vmem:[%s1402_s11] sm:$0xff] (!%p390_p9)   ;;  %v1041_v48 = vld [vmem:[%s1396_s5 + $0x8] sm:$0xff] (!%p390_p9)   ;;  %v1042_v49 = vld [vmem:[%s1396_s5 + $0x10] sm:$0xff] (!%p390_p9)  }
  0x16   : > { %951 = vmatprep.subr.bf16.mxu1 (!%p390_p9), %v1114_v13  ;;  %v1040_v47 = vld [vmem:[%s1396_s5] sm:$0xff] (!%p390_p9)   ;;  %v1043_v50 = vld [vmem:[%s1396_s5 + $0x18] sm:$0xff] (!%p390_p9)  }
  0x17   : > { %v919_v51 = vld [vmem:[%s1401_s10] ss:$0 sm:$0xff] (!%p390_p9) }
  0x18   : > { %972 = vmatpush3.bf16.msra.mxu0 (!%p390_p9), %v1033_v14  ;;  %v907_v59 = vld [vmem:[%s1395_s4] ss:$0 sm:$0xff] (!%p390_p9) }
  0x19   : > { %s433_s20 = scalar_select %p432_p10, %s1208_s29, 1  ;;  %977 = vmatprep.subr.bf16.mxu0 %v1114_v13  ;;  %952 = vmatpush3.bf16.msra.mxu1 %v1035_v31  ;;  %v905_v39 = vld [vmem:[%s1412_s1] ss:$0 sm:$0xff] }
  0x1a   : > { %957 = vmatprep.subr.bf16.mxu1 %v1114_v13  ;;  %v906_v41 = vld [vmem:[%s1413_s2] ss:$0 sm:$0xff] }
  0x1b   : > { %s904_s21 = sshll.u32 %s433_s20, 3  ;;  %s1405_s20 = smov 32   ;;  %v911_v12 = vld [vmem:[%s1397_s6] ss:$0 sm:$0xff] }
  0x1c   : > { %s435_s24 = scalar_lea.vmem %s1411_s0, %s904_s21  ;;  %s429_s21 = sand.u32 1, %s1102_s26  }
  0x1d   : > { %v1240_v0 = vld [vmem:[%s435_s24] sm:$0xff]  ;;  %s903_s24 = sshll.u32 %s429_s21, 3  ;;  %s827_s23 = scalar_lea.sflag [#allocation3], %s429_s21 }
  0x1e   : > { %641 = vrot.lane.b32.xlu0 %v1240_v0, %s1112_s30  ;;  %v455_v8 = vsel %vm454_vm0, %v1240_v0, 0.0 }
  0x90   : > { %v1244_v1 = vpop.permute.xlu0 %641 }
  0x91   : > { %v644_v2 = vsel %vm454_vm0, %v1244_v1, 0.0 }
  0x92   : > { %645 = vadd.xlane.f32.xlu0 %v644_v2 }
  0xa8   : > { %666 = vrot.lane.b32.xlu0 %v917_v3, %s1405_s20 }
  0xc7   : > { %456 = vadd.xlane.f32.xlu0 %v455_v8 }
 0x11f   : > { %v646_v4 = vpop.xlane.xlu0 %645 }
 0x120   : > { %v647_v5 = vmul.f32 0.03125, %v646_v4 }
 0x122   : > { %v648_v6 = vsub.f32 %v1240_v0, %v647_v5  ;;  %v923_v5 = vld [vmem:[%s1403_s12] ss:$0 sm:$0xff] }
 0x123   : > { %v667_v19 = vpop.permute.xlu0 %666 }
 0x124   : > { %v649_v7 = vmul.f32 %v648_v6, %v648_v6 }
 0x126   : > { %651 = vrot.lane.b32.xlu1 %v649_v7, %s1112_s30 }
 0x154   : > { %v457_v25 = vpop.xlane.xlu0 %456 }
 0x155   : > { %v459_v26 = vmul.f32 0.03125, %v457_v25 }
 0x157   : > { %v460_v27 = vsub.f32 %v1240_v0, %v459_v26 }
 0x159   : > { %v461_v28 = vmul.f32 %v460_v27, %v460_v27 }
 0x15b   : > { %v462_v29 = vsel %vm454_vm0, %v461_v28, 0.0 }
 0x198   : > { %v652_v9 = vpop.permute.xlu1 %651 }
 0x199   : > { %v654_v10 = vsel %vm454_vm0, %v652_v9, 0.0 }
 0x19a   : > { %655 = vadd.xlane.f32.xlu1 %v654_v10 }
 0x1ab   : > { %675 = vrot.lane.b32.xlu1 %v918_v11, %s1405_s20  ;;  %s930_s20 = sshll.u32 %s1208_s29, 7  ;;  %s1116_s29 = smov [#allocation2]  }
 0x1ac   : > { %s1349_s22 = scalar_lea.hbm %s1404_s13, %s930_s20 }
 0x227   : > { %v656_v15 = vpop.xlane.xlu1 %655 }
 0x228   : > { %v657_v16 = vmul.f32 0.03125, %v656_v15 }
 0x22a   : > { %v658_v17 = vadd.f32 1e-06, %v657_v16 }
 0x22b   : > { %v676_v21 = vpop.permute.xlu1 %675 }
 0x22c   : > { %1044 = vrsqrt.f32 %v658_v17 }
 0x236   : > { %v1045_v18 = vpop.eup %1044 }
 0x237   : > { %v660_v20 = vmul.f32 %v1045_v18, %v648_v6 }
 0x239   : > { %v669_v22 = vmul.f32 %v667_v19, %v660_v20 }
 0x23b   : > { %v678_v23 = vadd.f32 %v676_v21, %v669_v22 }
 0x23d   : > { %v679_v24 = vpack.c.bf16 %v678_v23, %v678_v23 }
 0x23f   : > { %687 = vrot.lane.b32.xlu1 %v679_v24, %s1112_s30  ;;  %s431_s30 = scalar_lea.vmem [#allocation2], %s903_s24  ;;  %s1052_s24 = sshll.u32 %s1116_s29, 4  ;;  %s1053_s24 = int_to_ptr.vmem [resolvable:$false] %s1052_s24 }
 0x240   : > { %s840_s15 = sshll.u32 %s431_s30, 4  ;;  %s1054_s2 = scalar_lea.vmem %s1053_s24, 256  ;;  %s1351_s15 = int_to_ptr.vmem [resolvable:$true] %s840_s15 }
 0x241   : > { %s1048_s1 = scalar_lea.vmem %s1351_s15, 128  ;;  %p1055_p0 = scmp.lt.s32.totalorder %s1351_s15, %s1053_s24 }
 0x242   : > { %p1049_p11 = scmp.ne.s32.totalorder %s1351_s15, %s1048_s1  ;;  %p1056_p1 = scmp.lt.s32.totalorder %s1054_s2, %s1048_s1 }
 0x244   : > { %p1050_p12 = pnand %p1049_p11, %p1225_p5  ;;  %p1057_p2 = por %p1056_p1, %p1055_p0 }
 0x246   : > { %p1051_p13 = pneg %p1050_p12 }
 0x248   : > { %p1058_p3 = pnand %p1057_p2, %p1051_p13 }
 0x263   : > { %463 = vadd.xlane.f32.xlu1 %v462_v29 }
 0x2b1   : > { %v688_v33 = vpop.permute.xlu1 %687 }
 0x2b2   : > { %974 = vmatmul.mubr.msk.bf16.vlgmr.msra.gmra.mrb[0].mxu0 %vm454_vm0, %v688_v33 }
 0x2b3   : > { %978 = vmatpush3.bf16.msra.mxu0 %v1036_v32  ;;  %985 = vmatprep.mubr.msk.bf16.mxu0 %vm1115_vm1, %v1114_v13 }
 0x2b4   : > { %979 = vmatprep.subr.bf16.mxu0 %v1114_v13 }
 0x2b7   : > { %980 = vmatpush3.bf16.msra.mxu0 %v1037_v34 }
 0x2b8   : > { %981 = vmatprep.subr.bf16.mxu0 %v1114_v13 }
 0x2bb   : > { %982 = vmatpush3.bf16.msra.mxu0 %v1038_v43 }
 0x2bc   : > { %983 = vmatprep.subr.bf16.mxu0 %v1114_v13 }
 0x2bf   : > { %984 = vmatpush3.bf16.msra.mxu0 %v1039_v46 }
 0x2f0   : > { %v464_v35 = vpop.xlane.xlu1 %463 }
 0x2f1   : > { %v465_v36 = vmul.f32 0.03125, %v464_v35 }
 0x2f3   : > { %v466_v37 = vadd.f32 1e-06, %v465_v36 }
 0x2f5   : > { %1046 = vrsqrt.f32 %v466_v37 }
 0x2ff   : > { %v1047_v38 = vpop.eup %1046 }
 0x300   : > { %v468_v40 = vmul.f32 %v1047_v38, %v460_v27 }
 0x302   : > { %v475_v42 = vmul.f32 %v905_v39, %v468_v40 }
 0x304   : > { %v482_v44 = vadd.f32 %v906_v41, %v475_v42 }
 0x306   : > { %v483_v45 = vpack.c.bf16 %v482_v44, %v482_v44 }
 0x308   : > { %954 = vmatmul.mubr.msk.bf16.vlgmr.msra.gmra.mrb[0].mxu1 %vm454_vm0, %v483_v45 }
 0x309   : > { %965 = vmatprep.mubr.msk.bf16.mxu1 %vm1115_vm1, %v1114_v13  ;;  %958 = vmatpush3.bf16.msra.mxu1 %v1040_v47 }
 0x30a   : > { %959 = vmatprep.subr.bf16.mxu1 %v1114_v13 }
 0x30d   : > { %960 = vmatpush3.bf16.msra.mxu1 %v1041_v48 }
 0x30e   : > { %961 = vmatprep.subr.bf16.mxu1 %v1114_v13 }
 0x311   : > { %962 = vmatpush3.bf16.msra.mxu1 %v1042_v49 }
 0x312   : > { %963 = vmatprep.subr.bf16.mxu1 %v1114_v13 }
 0x315   : > { %964 = vmatpush3.bf16.msra.mxu1 %v1043_v50 }
 0x385   : > { %v738_v52 = vpop.f32.mrb[0].mxu0 }
 0x386   : > { %v739_v53 = vadd.f32 %v919_v51, %v738_v52  ;;  %v975_v54 = vpop.f32.mrb[1].mxu0 }
 0x387   : > { %v741_v55 = vpop.f32.mrb[2].mxu0 }
 0x388   : > { %v744_v56 = vmax.f32 %v739_v53, 0.0  ;;  %v976_v57 = vpop.f32.mrb[3].mxu0 }
 0x38a   : > { %v745_v58 = vpack.c.bf16 %v744_v56, %v744_v56 }
 0x38c   : > { %986 = vmatmul.mubr.msk.bf16.vlgmr.msra.gmra.mrb[4].mxu0 %vm577_vm2, %v745_v58 }
 0x3db   : > { %v539_v60 = vpop.f32.mrb[0].mxu1 }
 0x3dc   : > { %v540_v61 = vadd.f32 %v907_v59, %v539_v60  ;;  %v955_v62 = vpop.f32.mrb[1].mxu1 }
 0x3dd   : > { %v542_v63 = vpop.f32.mrb[2].mxu1 }
 0x3de   : > { %v545_v2 = vmax.f32 %v540_v61, 0.0  ;;  %v956_v3 = vpop.f32.mrb[3].mxu1 }
 0x3e0   : > { %v546_v4 = vpack.c.bf16 %v545_v2, %v545_v2 }
 0x3e2   : > { %966 = vmatmul.mubr.msk.bf16.vlgmr.msra.gmra.mrb[4].mxu1 %vm577_vm2, %v546_v4 }
 0x45f   : > { %v813_v6 = vpop.f32.mrb[4].mxu0 }
 0x460   : > { %v814_v7 = vadd.f32 %v923_v5, %v813_v6  ;;  %v987_v8 = vpop.f32.mrb[5].mxu0 }
 0x461   : > { %v816_v9 = vpop.f32.mrb[6].mxu0 }
 0x462   : > { %v819_v10 = vadd.f32 %v814_v7, %v1244_v1  ;;  %v988_v11 = vpop.f32.mrb[7].mxu0 }
 0x464   : > { %821 = vrot.lane.b32.xlu0 %v819_v10, %s1414_s16 }
 0x4b5   : > { %v615_v13 = vpop.f32.mrb[4].mxu1 }
 0x4b6   : > { %v616_v14 = vadd.f32 %v911_v12, %v615_v13  ;;  %v967_v15 = vpop.f32.mrb[5].mxu1 }
 0x4b7   : > { %v618_v16 = vpop.f32.mrb[6].mxu1 }
 0x4b8   : > { %v621_v17 = vadd.f32 %v1240_v0, %v616_v14  ;;  %v968_v18 = vpop.f32.mrb[7].mxu1 }
 0x4ba   : > { %622 = vst.msk [vmem:[%s431_s30] sm:$0xff] %vm454_vm0, %v621_v17 }
 0x4d6   : > { %v822_v1 = vpop.permute.xlu0 %821 }
 0x4d7   : > { %825 = vst.msk [vmem:[%s431_s30] sm:$0xff] %vm824_vm3, %v822_v1 }
 0x4d8   : > { %1061 = shalt.err (!%p1058_p3)
}
 0x4d9   : > { %s1062_s0 = scalar_lea.hbm %s1349_s22, 128  ;;  %s1066_s20 = scalar_lea.hbm %s1404_s13, 256 }
 0x4da   : > { %p1063_p4 = scmp.ne.s32.totalorder %s1349_s22, %s1062_s0  ;;  %p1067_p9 = scmp.lt.u32.totalorder %s1349_s22, %s1404_s13 }
 0x4db   : > { %p1068_p10 = scmp.lt.u32.totalorder %s1066_s20, %s1062_s0  ;;  %p1070_p12 = scmp.lt.u32.totalorder %s1062_s0, %s1349_s22 }
 0x4dc   : > { %p1064_p7 = pnand %p1063_p4, %p1225_p5 }
 0x4dd   : > { %p1069_p11 = por %p1068_p10, %p1067_p9 }
 0x4de   : > { %p1065_p8 = pneg %p1064_p7 }
 0x4df   : > { %p1071_p13 = por %p1070_p12, %p1069_p11 }
 0x4e1   : > { %p1072_p0 = pnand %p1071_p13, %p1065_p8 }
 0x4e3   : > { %1075 = shalt.err (!%p1072_p0)
}
 0x4e4   : > { %989 = dma.vmem_to_hbm [thread:$0]  (%p1225_p5), %s1351_s15, 128, %s1349_s22, %s827_s23  }
 0x4e5 PF: > { %p995_p1 = scmp.ge.s32.totalorder %s1110_s28, 2  ;;  %s852_s1 = sand.u32 1, %s1098_s25  }
 0x4e6   : > { %s853_s2 = scalar_lea.sflag [#allocation3], %s852_s1 }
 0x4e7   : > { %p992_p2 = pnand %p995_p1, %p1229_p6 }
 0x4e9   : > { %1093 = dma.done.wait (!%p992_p2), %s853_s2, 128  }
 0x4ea   : > { %1095 = vsyncadd (!%p992_p2), %s853_s2, 4294967168  ;;  %p23_p3 = scmp.ge.s32.totalorder %s1212_s14, 4   ;;  %s1415_s25 = smov %s1102_s26 }
 0x4eb   : > { %s1416_s26 = smov %s1106_s27  ;;  %s1417_s27 = smov %s1223_s17 }
 0x4ec   : > { %s1418_s28 = smov %s1212_s14  ;;  %25 = sbr.rel (!%p23_p3) target bundleno = 7 (0x7), region = 107 }
 0x4f3   :  { %858 = vsyncpa [#allocation3], 1 }
 0x4f4   :  { %860 = vsyncpa [#allocation3 + $0x1], 1 }

// kernel: tpu_custom_call.1
= control target key start
LH: loop header
LB: loop body
LE: loop exit
PB: predicated region body
PF: predicated region fallthrough
CT: control target
= control target key end

     0   :  { %s1391_s0 = inlined_call_operand.vmem [shape: f32[16,64], index: 0, kind: input, shape index: {}]   ;;  %s1392_s1 = inlined_call_operand.vmem [shape: f32[1,32], index: 1, kind: input, shape index: {}]   ;;  %s1393_s2 = inlined_call_operand.vmem [shape: f32[1,32], index: 2, kind: input, shape index: {}]   ;;  %s1394_s3 = inlined_call_operand.vmem [shape: bf16[32,64], index: 3, kind: input, shape index: {}]   ;;  %s1395_s4 = inlined_call_operand.vmem [shape: f32[1,64], index: 4, kind: input, shape index: {}]   ;;  %s1396_s5 = inlined_call_operand.vmem [shape: bf16[64,32], index: 5, kind: input, shape index: {}]   ;;  %s1397_s6 = inlined_call_operand.vmem [shape: f32[1,32], index: 6, kind: input, shape index: {}]   ;;  %s1398_s7 = inlined_call_operand.vmem [shape: f32[1,32], index: 7, kind: input, shape index: {}]   ;;  %s1399_s8 = inlined_call_operand.vmem [shape: f32[1,32], index: 8, kind: input, shape index: {}]   ;;  %s1400_s9 = inlined_call_operand.vmem [shape: bf16[32,64], index: 9, kind: input, shape index: {}]   ;;  %s1401_s10 = inlined_call_operand.vmem [shape: f32[1,64], index: 10, kind: input, shape index: {}]   ;;  %s1402_s11 = inlined_call_operand.vmem [shape: bf16[64,32], index: 11, kind: input, shape index: {}]   ;;  %s1403_s12 = inlined_call_operand.vmem [shape: f32[1,32], index: 12, kind: input, shape index: {}]   ;;  %s1404_s13 = inlined_call_operand.hbm [shape: f32[16,64], index: 13, kind: output, shape index: {}]  }
   0x1   :  { %1406 = sst [smem:[#allocation5_spill]] %s1391_s0 }
   0x2   :  { %1407 = sst [smem:[#allocation6_spill]] %s1392_s1 }
   0x3   :  { %1408 = sst [smem:[#allocation7_spill]] %s1393_s2 }
   0x4   :  { %18 = vsyncpa [#allocation3], 0 }
   0x5   :  { %20 = vsyncpa [#allocation3 + $0x1], 0  ;;  %s1187_s25 = smov 0   ;;  %s1189_s26 = smov 0  }
   0x6   :  { %s1191_s27 = smov 0   ;;  %s1193_s28 = smov 0  }
   0x7 LB: > { %s1208_s29 = sadd.s32 4294967295, %s1110_s28   ;;  %s899_s30 = sadd.s32 4294967294, %s1110_s28   ;;  %s1110_s28 = sphi %s1193_s28, %s1418_s28   ;;  %s1106_s27 = sphi %s1191_s27, %s1417_s27   ;;  %s1102_s26 = sphi %s1189_s26, %s1416_s26   ;;  %s1098_s25 = sphi %s1187_s25, %s1415_s25  }
   0x8   : > { %s1212_s14 = sadd.s32 1, %s1110_s28   ;;  %s311_s15 = sadd.s32 1, %s1106_s27 }
   0x9   : > { %s308_s16 = ssub.s32 %s1110_s28, %s1212_s14  ;;  %p321_p0 = scmp.ne.s32.totalorder %s1106_s27, %s1102_s26 }
   0xa   : > { %p309_p1 = scmp.eq.s32.totalorder %s308_s16, 0  ;;  %p322_p2 = scmp.eq.s32.totalorder %s1208_s29, 1 }
   0xb   : > { %p327_p3 = scmp.ne.s32.totalorder %s1102_s26, %s1098_s25  ;;  %p328_p4 = scmp.eq.s32.totalorder %s899_s30, 1 }
   0xc   : > { %s1223_s17 = scalar_select %p309_p1, %s1106_s27, %s311_s15  }
   0xd   : > { %p1225_p5 = por %p322_p2, %p321_p0  ;;  %p1229_p6 = por %p328_p4, %p327_p3 }
   0xe   : > { %p902_p7 = scmp.ge.s32.totalorder %s1110_s28, 1  ;;  %p389_p8 = scmp.lt.s32.totalorder %s1110_s28, 3 }
  0x10   : > { %p390_p9 = pnand %p902_p7, %p389_p8 }
  0x11   : > { %p432_p10 = scmp.lt.s32.totalorder (!%p390_p9), %s1208_s29, 1  ;;  %s1411_s0 = sld [smem:[#allocation5_spill]] (!%p390_p9)  ;;  %vm454_vm0 = vcmask (!%p390_p9), 261120   ;;  %v917_v3 = vld [vmem:[%s1398_s7] ss:$0 sm:$0xff] (!%p390_p9)  ;;  %v1114_v13 = vmov (!%p390_p9), 0.0  }
  0x12   : > { %393 = sbr.rel (%p390_p9) target bundleno = 1253 (0x4e5), region = 72  ;;  %s1112_s30 = smov (!%p390_p9), 96   ;;  %v918_v11 = vld [vmem:[%s1399_s8] ss:$0 sm:$0xff] (!%p390_p9)  ;;  %969 = vmatprep.subr.bf16.mxu0 (!%p390_p9), %v1114_v13  ;;  %vm1115_vm1 = vmmov (!%p390_p9), 0   ;;  %v1033_v14 = vld [vmem:[%s1400_s9 + $0x8] sm:$0xff] (!%p390_p9)   ;;  %949 = vmatprep.subr.bf16.mxu1 (!%p390_p9), %v1114_v13 }
  0x13   : > { %v1032_v12 = vld [vmem:[%s1400_s9] sm:$0xff] (!%p390_p9)   ;;  %973 = vmatprep.mubr.msk.bf16.mxu0 (!%p390_p9), %vm1115_vm1, %v1114_v13  ;;  %953 = vmatprep.mubr.msk.bf16.mxu1 (!%p390_p9), %vm1115_vm1, %v1114_v13  ;;  %v1035_v31 = vld [vmem:[%s1394_s3 + $0x8] sm:$0xff] (!%p390_p9)   ;;  %s1412_s1 = sld [smem:[#allocation6_spill]] (!%p390_p9)  ;;  %s1413_s2 = sld [smem:[#allocation7_spill]] (!%p390_p9)  ;;  %v1038_v43 = vld [vmem:[%s1402_s11 + $0x10] sm:$0xff] (!%p390_p9)   ;;  %vm577_vm2 = vcmask (!%p390_p9), 523264  }
  0x14   : > { %970 = vmatpush3.bf16.msra.mxu0 (!%p390_p9), %v1032_v12  ;;  %v1034_v30 = vld [vmem:[%s1394_s3] sm:$0xff] (!%p390_p9)   ;;  %v1037_v34 = vld [vmem:[%s1402_s11 + $0x8] sm:$0xff] (!%p390_p9)   ;;  %v1039_v46 = vld [vmem:[%s1402_s11 + $0x18] sm:$0xff] (!%p390_p9)   ;;  %s1414_s16 = smov (!%p390_p9), 32   ;;  %vm824_vm3 = vcmask (!%p390_p9), 523520  }
  0x15   : > { %971 = vmatprep.subr.bf16.mxu0 (!%p390_p9), %v1114_v13  ;;  %950 = vmatpush3.bf16.msra.mxu1 (!%p390_p9), %v1034_v30  ;;  %v1036_v32 = vld [vmem:[%s1402_s11] sm:$0xff] (!%p390_p9)   ;;  %v1041_v48 = vld [vmem:[%s1396_s5 + $0x8] sm:$0xff] (!%p390_p9)   ;;  %v1042_v49 = vld [vmem:[%s1396_s5 + $0x10] sm:$0xff] (!%p390_p9)  }
  0x16   : > { %951 = vmatprep.subr.bf16.mxu1 (!%p390_p9), %v1114_v13  ;;  %v1040_v47 = vld [vmem:[%s1396_s5] sm:$0xff] (!%p390_p9)   ;;  %v1043_v50 = vld [vmem:[%s1396_s5 + $0x18] sm:$0xff] (!%p390_p9)  }
  0x17   : > { %v919_v51 = vld [vmem:[%s1401_s10] ss:$0 sm:$0xff] (!%p390_p9) }
  0x18   : > { %972 = vmatpush3.bf16.msra.mxu0 (!%p390_p9), %v1033_v14  ;;  %v907_v59 = vld [vmem:[%s1395_s4] ss:$0 sm:$0xff] (!%p390_p9) }
  0x19   : > { %s433_s20 = scalar_select %p432_p10, %s1208_s29, 1  ;;  %977 = vmatprep.subr.bf16.mxu0 %v1114_v13  ;;  %952 = vmatpush3.bf16.msra.mxu1 %v1035_v31  ;;  %v905_v39 = vld [vmem:[%s1412_s1] ss:$0 sm:$0xff] }
  0x1a   : > { %957 = vmatprep.subr.bf16.mxu1 %v1114_v13  ;;  %v906_v41 = vld [vmem:[%s1413_s2] ss:$0 sm:$0xff] }
  0x1b   : > { %s904_s21 = sshll.u32 %s433_s20, 3  ;;  %s1405_s20 = smov 32   ;;  %v911_v12 = vld [vmem:[%s1397_s6] ss:$0 sm:$0xff] }
  0x1c   : > { %s435_s24 = scalar_lea.vmem %s1411_s0, %s904_s21  ;;  %s429_s21 = sand.u32 1, %s1102_s26  }
  0x1d   : > { %v1240_v0 = vld [vmem:[%s435_s24] sm:$0xff]  ;;  %s903_s24 = sshll.u32 %s429_s21, 3  ;;  %s827_s23 = scalar_lea.sflag [#allocation3], %s429_s21 }
  0x1e   : > { %641 = vrot.lane.b32.xlu0 %v1240_v0, %s1112_s30  ;;  %v455_v8 = vsel %vm454_vm0, %v1240_v0, 0.0 }
  0x90   : > { %v1244_v1 = vpop.permute.xlu0 %641 }
  0x91   : > { %v644_v2 = vsel %vm454_vm0, %v1244_v1, 0.0 }
  0x92   : > { %645 = vadd.xlane.f32.xlu0 %v644_v2 }
  0xa8   : > { %666 = vrot.lane.b32.xlu0 %v917_v3, %s1405_s20 }
  0xc7   : > { %456 = vadd.xlane.f32.xlu0 %v455_v8 }
 0x11f   : > { %v646_v4 = vpop.xlane.xlu0 %645 }
 0x120   : > { %v647_v5 = vmul.f32 0.03125, %v646_v4 }
 0x122   : > { %v648_v6 = vsub.f32 %v1240_v0, %v647_v5  ;;  %v923_v5 = vld [vmem:[%s1403_s12] ss:$0 sm:$0xff] }
 0x123   : > { %v667_v19 = vpop.permute.xlu0 %666 }
 0x124   : > { %v649_v7 = vmul.f32 %v648_v6, %v648_v6 }
 0x126   : > { %651 = vrot.lane.b32.xlu1 %v649_v7, %s1112_s30 }
 0x154   : > { %v457_v25 = vpop.xlane.xlu0 %456 }
 0x155   : > { %v459_v26 = vmul.f32 0.03125, %v457_v25 }
 0x157   : > { %v460_v27 = vsub.f32 %v1240_v0, %v459_v26 }
 0x159   : > { %v461_v28 = vmul.f32 %v460_v27, %v460_v27 }
 0x15b   : > { %v462_v29 = vsel %vm454_vm0, %v461_v28, 0.0 }
 0x198   : > { %v652_v9 = vpop.permute.xlu1 %651 }
 0x199   : > { %v654_v10 = vsel %vm454_vm0, %v652_v9, 0.0 }
 0x19a   : > { %655 = vadd.xlane.f32.xlu1 %v654_v10 }
 0x1ab   : > { %675 = vrot.lane.b32.xlu1 %v918_v11, %s1405_s20  ;;  %s930_s20 = sshll.u32 %s1208_s29, 7  ;;  %s1116_s29 = smov [#allocation2]  }
 0x1ac   : > { %s1349_s22 = scalar_lea.hbm %s1404_s13, %s930_s20 }
 0x227   : > { %v656_v15 = vpop.xlane.xlu1 %655 }
 0x228   : > { %v657_v16 = vmul.f32 0.03125, %v656_v15 }
 0x22a   : > { %v658_v17 = vadd.f32 1e-06, %v657_v16 }
 0x22b   : > { %v676_v21 = vpop.permute.xlu1 %675 }
 0x22c   : > { %1044 = vrsqrt.f32 %v658_v17 }
 0x236   : > { %v1045_v18 = vpop.eup %1044 }
 0x237   : > { %v660_v20 = vmul.f32 %v1045_v18, %v648_v6 }
 0x239   : > { %v669_v22 = vmul.f32 %v667_v19, %v660_v20 }
 0x23b   : > { %v678_v23 = vadd.f32 %v676_v21, %v669_v22 }
 0x23d   : > { %v679_v24 = vpack.c.bf16 %v678_v23, %v678_v23 }
 0x23f   : > { %687 = vrot.lane.b32.xlu1 %v679_v24, %s1112_s30  ;;  %s431_s30 = scalar_lea.vmem [#allocation2], %s903_s24  ;;  %s1052_s24 = sshll.u32 %s1116_s29, 4  ;;  %s1053_s24 = int_to_ptr.vmem [resolvable:$false] %s1052_s24 }
 0x240   : > { %s840_s15 = sshll.u32 %s431_s30, 4  ;;  %s1054_s2 = scalar_lea.vmem %s1053_s24, 256  ;;  %s1351_s15 = int_to_ptr.vmem [resolvable:$true] %s840_s15 }
 0x241   : > { %s1048_s1 = scalar_lea.vmem %s1351_s15, 128  ;;  %p1055_p0 = scmp.lt.s32.totalorder %s1351_s15, %s1053_s24 }
 0x242   : > { %p1049_p11 = scmp.ne.s32.totalorder %s1351_s15, %s1048_s1  ;;  %p1056_p1 = scmp.lt.s32.totalorder %s1054_s2, %s1048_s1 }
 0x244   : > { %p1050_p12 = pnand %p1049_p11, %p1225_p5  ;;  %p1057_p2 = por %p1056_p1, %p1055_p0 }
 0x246   : > { %p1051_p13 = pneg %p1050_p12 }
 0x248   : > { %p1058_p3 = pnand %p1057_p2, %p1051_p13 }
 0x263   : > { %463 = vadd.xlane.f32.xlu1 %v462_v29 }
 0x2b1   : > { %v688_v33 = vpop.permute.xlu1 %687 }
 0x2b2   : > { %974 = vmatmul.mubr.msk.bf16.vlgmr.msra.gmra.mrb[0].mxu0 %vm454_vm0, %v688_v33 }
 0x2b3   : > { %978 = vmatpush3.bf16.msra.mxu0 %v1036_v32  ;;  %985 = vmatprep.mubr.msk.bf16.mxu0 %vm1115_vm1, %v1114_v13 }
 0x2b4   : > { %979 = vmatprep.subr.bf16.mxu0 %v1114_v13 }
 0x2b7   : > { %980 = vmatpush3.bf16.msra.mxu0 %v1037_v34 }
 0x2b8   : > { %981 = vmatprep.subr.bf16.mxu0 %v1114_v13 }
 0x2bb   : > { %982 = vmatpush3.bf16.msra.mxu0 %v1038_v43 }
 0x2bc   : > { %983 = vmatprep.subr.bf16.mxu0 %v1114_v13 }
 0x2bf   : > { %984 = vmatpush3.bf16.msra.mxu0 %v1039_v46 }
 0x2f0   : > { %v464_v35 = vpop.xlane.xlu1 %463 }
 0x2f1   : > { %v465_v36 = vmul.f32 0.03125, %v464_v35 }
 0x2f3   : > { %v466_v37 = vadd.f32 1e-06, %v465_v36 }
 0x2f5   : > { %1046 = vrsqrt.f32 %v466_v37 }
 0x2ff   : > { %v1047_v38 = vpop.eup %1046 }
 0x300   : > { %v468_v40 = vmul.f32 %v1047_v38, %v460_v27 }
 0x302   : > { %v475_v42 = vmul.f32 %v905_v39, %v468_v40 }
 0x304   : > { %v482_v44 = vadd.f32 %v906_v41, %v475_v42 }
 0x306   : > { %v483_v45 = vpack.c.bf16 %v482_v44, %v482_v44 }
 0x308   : > { %954 = vmatmul.mubr.msk.bf16.vlgmr.msra.gmra.mrb[0].mxu1 %vm454_vm0, %v483_v45 }
 0x309   : > { %965 = vmatprep.mubr.msk.bf16.mxu1 %vm1115_vm1, %v1114_v13  ;;  %958 = vmatpush3.bf16.msra.mxu1 %v1040_v47 }
 0x30a   : > { %959 = vmatprep.subr.bf16.mxu1 %v1114_v13 }
 0x30d   : > { %960 = vmatpush3.bf16.msra.mxu1 %v1041_v48 }
 0x30e   : > { %961 = vmatprep.subr.bf16.mxu1 %v1114_v13 }
 0x311   : > { %962 = vmatpush3.bf16.msra.mxu1 %v1042_v49 }
 0x312   : > { %963 = vmatprep.subr.bf16.mxu1 %v1114_v13 }
 0x315   : > { %964 = vmatpush3.bf16.msra.mxu1 %v1043_v50 }
 0x385   : > { %v738_v52 = vpop.f32.mrb[0].mxu0 }
 0x386   : > { %v739_v53 = vadd.f32 %v919_v51, %v738_v52  ;;  %v975_v54 = vpop.f32.mrb[1].mxu0 }
 0x387   : > { %v741_v55 = vpop.f32.mrb[2].mxu0 }
 0x388   : > { %v744_v56 = vmax.f32 %v739_v53, 0.0  ;;  %v976_v57 = vpop.f32.mrb[3].mxu0 }
 0x38a   : > { %v745_v58 = vpack.c.bf16 %v744_v56, %v744_v56 }
 0x38c   : > { %986 = vmatmul.mubr.msk.bf16.vlgmr.msra.gmra.mrb[4].mxu0 %vm577_vm2, %v745_v58 }
 0x3db   : > { %v539_v60 = vpop.f32.mrb[0].mxu1 }
 0x3dc   : > { %v540_v61 = vadd.f32 %v907_v59, %v539_v60  ;;  %v955_v62 = vpop.f32.mrb[1].mxu1 }
 0x3dd   : > { %v542_v63 = vpop.f32.mrb[2].mxu1 }
 0x3de   : > { %v545_v2 = vmax.f32 %v540_v61, 0.0  ;;  %v956_v3 = vpop.f32.mrb[3].mxu1 }
 0x3e0   : > { %v546_v4 = vpack.c.bf16 %v545_v2, %v545_v2 }
 0x3e2   : > { %966 = vmatmul.mubr.msk.bf16.vlgmr.msra.gmra.mrb[4].mxu1 %vm577_vm2, %v546_v4 }
 0x45f   : > { %v813_v6 = vpop.f32.mrb[4].mxu0 }
 0x460   : > { %v814_v7 = vadd.f32 %v923_v5, %v813_v6  ;;  %v987_v8 = vpop.f32.mrb[5].mxu0 }
 0x461   : > { %v816_v9 = vpop.f32.mrb[6].mxu0 }
 0x462   : > { %v819_v10 = vadd.f32 %v814_v7, %v1244_v1  ;;  %v988_v11 = vpop.f32.mrb[7].mxu0 }
 0x464   : > { %821 = vrot.lane.b32.xlu0 %v819_v10, %s1414_s16 }
 0x4b5   : > { %v615_v13 = vpop.f32.mrb[4].mxu1 }
 0x4b6   : > { %v616_v14 = vadd.f32 %v911_v12, %v615_v13  ;;  %v967_v15 = vpop.f32.mrb[5].mxu1 }
 0x4b7   : > { %v618_v16 = vpop.f32.mrb[6].mxu1 }
 0x4b8   : > { %v621_v17 = vadd.f32 %v1240_v0, %v616_v14  ;;  %v968_v18 = vpop.f32.mrb[7].mxu1 }
 0x4ba   : > { %622 = vst.msk [vmem:[%s431_s30] sm:$0xff] %vm454_vm0, %v621_v17 }
 0x4d6   : > { %v822_v1 = vpop.permute.xlu0 %821 }
 0x4d7   : > { %825 = vst.msk [vmem:[%s431_s30] sm:$0xff] %vm824_vm3, %v822_v1 }
 0x4d8   : > { %1061 = shalt.err (!%p1058_p3)
}
 0x4d9   : > { %s1062_s0 = scalar_lea.hbm %s1349_s22, 128  ;;  %s1066_s20 = scalar_lea.hbm %s1404_s13, 256 }
 0x4da   : > { %p1063_p4 = scmp.ne.s32.totalorder %s1349_s22, %s1062_s0  ;;  %p1067_p9 = scmp.lt.u32.totalorder %s1349_s22, %s1404_s13 }
 0x4db   : > { %p1068_p10 = scmp.lt.u32.totalorder %s1066_s20, %s1062_s0  ;;  %p1070_p12 = scmp.lt.u32.totalorder %s1062_s0, %s1349_s22 }
 0x4dc   : > { %p1064_p7 = pnand %p1063_p4, %p1225_p5 }
 0x4dd   : > { %p1069_p11 = por %p1068_p10, %p1067_p9 }
 0x4de   : > { %p1065_p8 = pneg %p1064_p7 }
 0x4df   : > { %p1071_p13 = por %p1070_p12, %p1069_p11 }
 0x4e1   : > { %p1072_p0 = pnand %p1071_p13, %p1065_p8 }
 0x4e3   : > { %1075 = shalt.err (!%p1072_p0)
}
 0x4e4   : > { %989 = dma.vmem_to_hbm [thread:$0]  (%p1225_p5), %s1351_s15, 128, %s1349_s22, %s827_s23  }
 0x4e5 PF: > { %p995_p1 = scmp.ge.s32.totalorder %s1110_s28, 2  ;;  %s852_s1 = sand.u32 1, %s1098_s25  }
 0x4e6   : > { %s853_s2 = scalar_lea.sflag [#allocation3], %s852_s1 }
 0x4e7   : > { %p992_p2 = pnand %p995_p1, %p1229_p6 }
 0x4e9   : > { %1093 = dma.done.wait (!%p992_p2), %s853_s2, 128  }
 0x4ea   : > { %1095 = vsyncadd (!%p992_p2), %s853_s2, 4294967168  ;;  %p23_p3 = scmp.ge.s32.totalorder %s1212_s14, 4   ;;  %s1415_s25 = smov %s1102_s26 }
 0x4eb   : > { %s1416_s26 = smov %s1106_s27  ;;  %s1417_s27 = smov %s1223_s17 }
 0x4ec   : > { %s1418_s28 = smov %s1212_s14  ;;  %25 = sbr.rel (!%p23_p3) target bundleno = 7 (0x7), region = 107 }
 0x4f3   :  { %858 = vsyncpa [#allocation3], 1 }
 0x4f4   :  { %860 = vsyncpa [#allocation3 + $0x1], 1 }

</bundles_post_ra>
